<compile_context>
chip_gen: v7x
topology: tpu7x:2x2x1
jax: 0.10.0
libtpu: 0.0.40
codegen_flags: <defaults>
</compile_context>

<pallas_src>
import math

import jax
import jax.numpy as jnp
from jax.experimental import pallas as pl
from jax.experimental.pallas import tpu as pltpu


def _round_up(x, m):
    return ((x + m - 1) // m) * m


# Batch-tile cap.  At TB=512 the f32 intermediates (h1, h2, y) plus the
# resident weights are ~2 MB of VMEM -> no generation needs a limit override.
_TB_MAX = 512


def _pick_batch_tile(B):
    """Pick the batch tile: as few grid steps as possible, but >=2 steps once
    the batch is large enough that v7x's second TensorCore is worth using."""
    if B <= 128:
        return _round_up(B, 16)                # single step; splitting adds overhead
    if B <= 2 * _TB_MAX:
        return _round_up((B + 1) // 2, 16)     # exactly 2 steps -> both v7x TCs busy
    return _TB_MAX


def _qdqn_kernel(x_ref, w1_ref, b1_ref, w2_ref, b2_ref, w3_ref, b3_ref, out_ref):
    # Layer 1 in f32 (K = state_space is tiny; keeps parity with the f32 module).
    h1 = jnp.dot(x_ref[...], w1_ref[...], preferred_element_type=jnp.float32)
    # Bias + ReLU in f32 on the VPU; cast to the MXU dtype in-kernel (free filler).
    h1 = jnp.maximum(h1 + b1_ref[...], 0.0).astype(w2_ref.dtype)
    # Layer 2: bf16 @ bf16 -> f32 accumulate.
    h2 = jnp.dot(h1, w2_ref[...], preferred_element_type=jnp.float32)
    h2 = jnp.maximum(h2 + b2_ref[...], 0.0).astype(w3_ref.dtype)
    # Layer 3 (no activation), lane-dense (zero-padded) output width.
    y = jnp.dot(h2, w3_ref[...], preferred_element_type=jnp.float32)
    out_ref[...] = (y + b3_ref[...]).astype(out_ref.dtype)


def prepare_qdqn_params(params, action_space, n_quantiles,
                        compute_dtype=jnp.bfloat16):
    """One-time parameter prep (do this once, NOT per forward call).

    * Layer-1 weights stay f32 so the state input never loses precision.
    * Layer-2/3 weights are cast to the MXU compute dtype (bf16).
    * The last layer is zero-padded to a lane-dense width (multiple of 128).
    * Biases stay f32 (added after the f32 accumulation).
    """
    w1, b1, w2, b2, w3, b3 = params
    out_dim = action_space * n_quantiles
    out_pad = _round_up(out_dim, 128)
    if out_pad != out_dim:
        w3 = jnp.pad(w3, ((0, 0), (0, out_pad - out_dim)))
        b3 = jnp.pad(b3, ((0, 0), (0, out_pad - out_dim)))
    return (w1.astype(jnp.float32), b1.astype(jnp.float32),
            w2.astype(compute_dtype), b2.astype(jnp.float32),
            w3.astype(compute_dtype), b3.astype(jnp.float32))


def qdqn_forward(x, prepared_params, action_space, n_quantiles):
    """Fused QDQN forward.

    x: (B, state_space) f32.  prepared_params: from prepare_qdqn_params().
    Returns (B, action_space, n_quantiles) f32.
    """
    w1, b1, w2, b2, w3, b3 = prepared_params
    B, S = x.shape
    out_dim = action_space * n_quantiles
    out_pad = w3.shape[1]

    TB = _pick_batch_tile(B)
    Bp = _round_up(B, TB)
    if Bp != B:
        x = jnp.pad(x, ((0, Bp - B), (0, 0)))   # padded rows are sliced off below
    x = x.astype(jnp.float32)

    def _run(single_buffer_weights):
        if single_buffer_weights:
            # Constant index maps -> the weights/biases never change blocks, so a
            # single VMEM buffer suffices (no double-buffer, less bookkeeping).
            def resident(shape):
                return pl.BlockSpec(shape, lambda i: (0, 0),
                                    pipeline_mode=pl.Buffered(1))
        else:
            def resident(shape):
                return pl.BlockSpec(shape, lambda i: (0, 0))

        return pl.pallas_call(
            _qdqn_kernel,
            out_shape=jax.ShapeDtypeStruct((Bp, out_pad), jnp.float32),
            grid=(Bp // TB,),
            in_specs=[
                pl.BlockSpec((TB, S), lambda i: (i, 0)),
                resident(w1.shape), resident(b1.shape),
                resident(w2.shape), resident(b2.shape),
                resident(w3.shape), resident(b3.shape),
            ],
            out_specs=pl.BlockSpec((TB, out_pad), lambda i: (i, 0)),
            compiler_params=pltpu.CompilerParams(
                dimension_semantics=("parallel",)),
        )(x, w1, b1, w2, b2, w3, b3)

    try:
        y = _run(single_buffer_weights=True)
    except Exception:
        # pl.Buffered(1) not supported on this JAX/Mosaic build -> default specs.
        y = _run(single_buffer_weights=False)

    # Drop batch/lane padding, then torch's .view(-1, A, Q) equivalent (glue).
    return y[:B, :out_dim].reshape(-1, action_space, n_quantiles)


def init_qdqn_params(key, state_space, action_space,
                     hidden_layer_1=128, hidden_layer_2=128, n_quantiles=51):
    """Deterministic init mimicking nn.Linear's U(-1/sqrt(fan_in), 1/sqrt(fan_in)).

    Weights are stored transposed relative to PyTorch: (in_features, out_features).
    Biases are stored (1, out_features) so they live cleanly as 2-D VMEM tiles.
    """
    def linear(key, fan_in, fan_out):
        kw, kb = jax.random.split(key)
        bound = 1.0 / math.sqrt(fan_in)
        w = jax.random.uniform(kw, (fan_in, fan_out), jnp.float32, -bound, bound)
        b = jax.random.uniform(kb, (1, fan_out), jnp.float32, -bound, bound)
        return w, b

    k1, k2, k3 = jax.random.split(key, 3)
    w1, b1 = linear(k1, state_space, hidden_layer_1)
    w2, b2 = linear(k2, hidden_layer_1, hidden_layer_2)
    w3, b3 = linear(k3, hidden_layer_2, action_space * n_quantiles)
    return (w1, b1, w2, b2, w3, b3)


def qdqn_forward_ref(x, params, action_space, n_quantiles,
                     compute_dtype=jnp.float32):
    """Pure-JAX reference.  Layer 1 always f32; layers 2/3 optionally cast to
    `compute_dtype` to mirror the kernel's numeric path."""
    w1, b1, w2, b2, w3, b3 = params
    h1 = jnp.maximum(
        jnp.dot(x, w1, preferred_element_type=jnp.float32) + b1, 0.0)
    h2 = jnp.maximum(
        jnp.dot(h1.astype(compute_dtype), w2.astype(compute_dtype),
                preferred_element_type=jnp.float32) + b2, 0.0)
    y = jnp.dot(h2.astype(compute_dtype), w3.astype(compute_dtype),
                preferred_element_type=jnp.float32) + b3
    return y.reshape(-1, action_space, n_quantiles)


if __name__ == "__main__":
    # Small shapes consistent with the module (module-default hidden sizes).
    batch = 8
    state_space = 16
    hidden_layer_1 = 128
    hidden_layer_2 = 128
    action_space = 4
    n_quantiles = 51

    key = jax.random.PRNGKey(0)
    k_params, k_x = jax.random.split(key)

    params = init_qdqn_params(
        k_params, state_space, action_space,
        hidden_layer_1=hidden_layer_1, hidden_layer_2=hidden_layer_2,
        n_quantiles=n_quantiles,
    )
    prepared = prepare_qdqn_params(params, action_space, n_quantiles)
    x = jax.random.normal(k_x, (batch, state_space), dtype=jnp.float32)

    out = jax.block_until_ready(
        qdqn_forward(x, prepared, action_space, n_quantiles))
    assert out.shape == (batch, action_space, n_quantiles), out.shape

    # Check vs a reference matching the kernel's dtype path
    # (f32 layer 1, bf16 layers 2/3, f32 accumulation everywhere).
    ref_mixed = qdqn_forward_ref(x, params, action_space, n_quantiles,
                                 compute_dtype=jnp.bfloat16)
    assert jnp.allclose(out, ref_mixed, atol=1e-2, rtol=1e-2), \
        "mismatch vs bf16-matched reference"

    # Check vs the full-f32 PyTorch-equivalent reference (bf16 rounding only).
    ref_f32 = qdqn_forward_ref(x, params, action_space, n_quantiles,
                               compute_dtype=jnp.float32)
    assert jnp.allclose(out, ref_f32, atol=5e-2, rtol=5e-2), \
        "mismatch vs f32 reference"

    # Exercise the multi-step grid path (>=2 steps, batch padding) as well.
    x_big = jax.random.normal(jax.random.PRNGKey(1), (200, state_space),
                              dtype=jnp.float32)
    out_big = jax.block_until_ready(
        qdqn_forward(x_big, prepared, action_space, n_quantiles))
    assert out_big.shape == (200, action_space, n_quantiles), out_big.shape
    ref_big = qdqn_forward_ref(x_big, params, action_space, n_quantiles,
                               compute_dtype=jnp.bfloat16)
    assert jnp.allclose(out_big, ref_big, atol=1e-2, rtol=1e-2), \
        "mismatch vs bf16-matched reference (multi-step grid)"

    print("KERNEL_OK")
</pallas_src>

<mosaic_0001>
module attributes {stable_mosaic.version = 11 : i64} {
  func.func @_qdqn_kernel(%arg0: i32, %arg1: memref<16x16xf32, #tpu.memory_space<vmem>>, %arg2: memref<16x128xf32, #tpu.memory_space<vmem>>, %arg3: memref<1x128xf32, #tpu.memory_space<vmem>>, %arg4: memref<128x128xbf16, #tpu.memory_space<vmem>>, %arg5: memref<1x128xf32, #tpu.memory_space<vmem>>, %arg6: memref<128x256xbf16, #tpu.memory_space<vmem>>, %arg7: memref<1x256xf32, #tpu.memory_space<vmem>>, %arg8: memref<16x256xf32, #tpu.memory_space<vmem>>) attributes {dimension_semantics = [#tpu.dimension_semantics<parallel>], iteration_bounds = array<i64: 1>, scalar_prefetch = 0 : i64, scratch_operands = 0 : i64, tpu.core_type = #tpu.core_type<tc>, window_params = [{transform_indices = @transform_0, window_bounds = array<i64: 16, 16>}, {pipeline_mode = #tpu.pipeline_mode<synchronous>, transform_indices = @transform_1, window_bounds = array<i64: 16, 128>}, {pipeline_mode = #tpu.pipeline_mode<synchronous>, transform_indices = @transform_2, window_bounds = array<i64: 1, 128>}, {pipeline_mode = #tpu.pipeline_mode<synchronous>, transform_indices = @transform_3, window_bounds = array<i64: 128, 128>}, {pipeline_mode = #tpu.pipeline_mode<synchronous>, transform_indices = @transform_4, window_bounds = array<i64: 1, 128>}, {pipeline_mode = #tpu.pipeline_mode<synchronous>, transform_indices = @transform_5, window_bounds = array<i64: 128, 256>}, {pipeline_mode = #tpu.pipeline_mode<synchronous>, transform_indices = @transform_6, window_bounds = array<i64: 1, 256>}, {transform_indices = @transform_7, window_bounds = array<i64: 16, 256>}]} {
    %c0 = arith.constant 0 : index
    %c0_0 = arith.constant 0 : index
    %0 = vector.load %arg1[%c0, %c0_0] : memref<16x16xf32, #tpu.memory_space<vmem>>, vector<16x16xf32>
    %c0_1 = arith.constant 0 : index
    %c0_2 = arith.constant 0 : index
    %1 = vector.load %arg2[%c0_1, %c0_2] : memref<16x128xf32, #tpu.memory_space<vmem>>, vector<16x128xf32>
    %cst = arith.constant dense<0.000000e+00> : vector<16x128xf32>
    %2 = tpu.matmul %0, %1, %cst {dimension_numbers = #tpu.dot_dimension_numbers<[1], [0], [0], [1], [0, 0, 1, 1], [], []>} : vector<16x16xf32>, vector<16x128xf32>, vector<16x128xf32> -> vector<16x128xf32>
    %c0_3 = arith.constant 0 : index
    %c0_4 = arith.constant 0 : index
    %3 = vector.load %arg3[%c0_3, %c0_4] : memref<1x128xf32, #tpu.memory_space<vmem>>, vector<1x128xf32>
    %4 = vector.broadcast %3 : vector<1x128xf32> to vector<16x128xf32>
    %5 = arith.addf %2, %4 : vector<16x128xf32>
    %cst_5 = arith.constant 0.000000e+00 : f32
    %6 = vector.broadcast %cst_5 : f32 to vector<16x128xf32>
    %7 = arith.maximumf %5, %6 : vector<16x128xf32>
    %8 = arith.truncf %7 : vector<16x128xf32> to vector<16x128xbf16>
    %c0_6 = arith.constant 0 : index
    %c0_7 = arith.constant 0 : index
    %9 = vector.load %arg4[%c0_6, %c0_7] : memref<128x128xbf16, #tpu.memory_space<vmem>>, vector<128x128xbf16>
    %cst_8 = arith.constant dense<0.000000e+00> : vector<16x128xf32>
    %10 = tpu.matmul %8, %9, %cst_8 {dimension_numbers = #tpu.dot_dimension_numbers<[1], [0], [0], [1], [0, 0, 1, 1], [], []>} : vector<16x128xbf16>, vector<128x128xbf16>, vector<16x128xf32> -> vector<16x128xf32>
    %c0_9 = arith.constant 0 : index
    %c0_10 = arith.constant 0 : index
    %11 = vector.load %arg5[%c0_9, %c0_10] : memref<1x128xf32, #tpu.memory_space<vmem>>, vector<1x128xf32>
    %12 = vector.broadcast %11 : vector<1x128xf32> to vector<16x128xf32>
    %13 = arith.addf %10, %12 : vector<16x128xf32>
    %cst_11 = arith.constant 0.000000e+00 : f32
    %14 = vector.broadcast %cst_11 : f32 to vector<16x128xf32>
    %15 = arith.maximumf %13, %14 : vector<16x128xf32>
    %16 = arith.truncf %15 : vector<16x128xf32> to vector<16x128xbf16>
    %c0_12 = arith.constant 0 : index
    %c0_13 = arith.constant 0 : index
    %17 = vector.load %arg6[%c0_12, %c0_13] : memref<128x256xbf16, #tpu.memory_space<vmem>>, vector<128x256xbf16>
    %cst_14 = arith.constant dense<0.000000e+00> : vector<16x256xf32>
    %18 = tpu.matmul %16, %17, %cst_14 {dimension_numbers = #tpu.dot_dimension_numbers<[1], [0], [0], [1], [0, 0, 1, 1], [], []>} : vector<16x128xbf16>, vector<128x256xbf16>, vector<16x256xf32> -> vector<16x256xf32>
    %c0_15 = arith.constant 0 : index
    %c0_16 = arith.constant 0 : index
    %19 = vector.load %arg7[%c0_15, %c0_16] : memref<1x256xf32, #tpu.memory_space<vmem>>, vector<1x256xf32>
    %20 = vector.broadcast %19 : vector<1x256xf32> to vector<16x256xf32>
    %21 = arith.addf %18, %20 : vector<16x256xf32>
    %c0_17 = arith.constant 0 : index
    %c0_18 = arith.constant 0 : index
    %22 = vector.load %arg8[%c0_17, %c0_18] : memref<16x256xf32, #tpu.memory_space<vmem>>, vector<16x256xf32>
    tpu.vector_store %arg8[%c0_17, %c0_18], %21 {strides = array<i32>} : memref<16x256xf32, #tpu.memory_space<vmem>>, vector<16x256xf32>,
    return
  }
  func.func @transform_0(%arg0: i32) -> (i32, i32) {
    %c0_i32 = arith.constant 0 : i32
    %c0_i32_0 = arith.constant 0 : i32
    return %arg0, %c0_i32 : i32, i32
  }
  func.func @transform_1(%arg0: i32) -> (i32, i32) {
    %c0_i32 = arith.constant 0 : i32
    %c0_i32_0 = arith.constant 0 : i32
    %c0_i32_1 = arith.constant 0 : i32
    return %c0_i32, %c0_i32_0 : i32, i32
  }
  func.func @transform_2(%arg0: i32) -> (i32, i32) {
    %c0_i32 = arith.constant 0 : i32
    %c0_i32_0 = arith.constant 0 : i32
    %c0_i32_1 = arith.constant 0 : i32
    return %c0_i32, %c0_i32_0 : i32, i32
  }
  func.func @transform_3(%arg0: i32) -> (i32, i32) {
    %c0_i32 = arith.constant 0 : i32
    %c0_i32_0 = arith.constant 0 : i32
    %c0_i32_1 = arith.constant 0 : i32
    return %c0_i32, %c0_i32_0 : i32, i32
  }
  func.func @transform_4(%arg0: i32) -> (i32, i32) {
    %c0_i32 = arith.constant 0 : i32
    %c0_i32_0 = arith.constant 0 : i32
    %c0_i32_1 = arith.constant 0 : i32
    return %c0_i32, %c0_i32_0 : i32, i32
  }
  func.func @transform_5(%arg0: i32) -> (i32, i32) {
    %c0_i32 = arith.constant 0 : i32
    %c0_i32_0 = arith.constant 0 : i32
    %c0_i32_1 = arith.constant 0 : i32
    return %c0_i32, %c0_i32_0 : i32, i32
  }
  func.func @transform_6(%arg0: i32) -> (i32, i32) {
    %c0_i32 = arith.constant 0 : i32
    %c0_i32_0 = arith.constant 0 : i32
    %c0_i32_1 = arith.constant 0 : i32
    return %c0_i32, %c0_i32_0 : i32, i32
  }
  func.func @transform_7(%arg0: i32) -> (i32, i32) {
    %c0_i32 = arith.constant 0 : i32
    %c0_i32_0 = arith.constant 0 : i32
    return %arg0, %c0_i32 : i32, i32
  }
}

module attributes {stable_mosaic.version = 11 : i64} {
  func.func @_qdqn_kernel(%arg0: i32, %arg1: memref<16x16xf32, #tpu.memory_space<vmem>>, %arg2: memref<16x128xf32, #tpu.memory_space<vmem>>, %arg3: memref<1x128xf32, #tpu.memory_space<vmem>>, %arg4: memref<128x128xbf16, #tpu.memory_space<vmem>>, %arg5: memref<1x128xf32, #tpu.memory_space<vmem>>, %arg6: memref<128x256xbf16, #tpu.memory_space<vmem>>, %arg7: memref<1x256xf32, #tpu.memory_space<vmem>>, %arg8: memref<16x256xf32, #tpu.memory_space<vmem>>) attributes {dimension_semantics = [#tpu.dimension_semantics<parallel>], iteration_bounds = array<i64: 1>, scalar_prefetch = 0 : i64, scratch_operands = 0 : i64, tpu.core_type = #tpu.core_type<tc>, window_params = [{transform_indices = @transform_0, window_bounds = array<i64: 16, 16>}, {pipeline_mode = #tpu.pipeline_mode<synchronous>, transform_indices = @transform_1, window_bounds = array<i64: 16, 128>}, {pipeline_mode = #tpu.pipeline_mode<synchronous>, transform_indices = @transform_2, window_bounds = array<i64: 1, 128>}, {pipeline_mode = #tpu.pipeline_mode<synchronous>, transform_indices = @transform_3, window_bounds = array<i64: 128, 128>}, {pipeline_mode = #tpu.pipeline_mode<synchronous>, transform_indices = @transform_4, window_bounds = array<i64: 1, 128>}, {pipeline_mode = #tpu.pipeline_mode<synchronous>, transform_indices = @transform_5, window_bounds = array<i64: 128, 256>}, {pipeline_mode = #tpu.pipeline_mode<synchronous>, transform_indices = @transform_6, window_bounds = array<i64: 1, 256>}, {transform_indices = @transform_7, window_bounds = array<i64: 16, 256>}]} {
    %c0 = arith.constant 0 : index
    %c0_0 = arith.constant 0 : index
    %0 = vector.load %arg1[%c0, %c0_0] : memref<16x16xf32, #tpu.memory_space<vmem>>, vector<16x16xf32>
    %c0_1 = arith.constant 0 : index
    %c0_2 = arith.constant 0 : index
    %1 = vector.load %arg2[%c0_1, %c0_2] : memref<16x128xf32, #tpu.memory_space<vmem>>, vector<16x128xf32>
    %cst = arith.constant dense<0.000000e+00> : vector<16x128xf32>
    %2 = tpu.matmul %0, %1, %cst {dimension_numbers = #tpu.dot_dimension_numbers<[1], [0], [0], [1], [0, 0, 1, 1], [], []>} : vector<16x16xf32>, vector<16x128xf32>, vector<16x128xf32> -> vector<16x128xf32>
    %c0_3 = arith.constant 0 : index
    %c0_4 = arith.constant 0 : index
    %3 = vector.load %arg3[%c0_3, %c0_4] : memref<1x128xf32, #tpu.memory_space<vmem>>, vector<1x128xf32>
    %4 = vector.broadcast %3 : vector<1x128xf32> to vector<16x128xf32>
    %5 = arith.addf %2, %4 : vector<16x128xf32>
    %cst_5 = arith.constant 0.000000e+00 : f32
    %6 = vector.broadcast %cst_5 : f32 to vector<16x128xf32>
    %7 = arith.maximumf %5, %6 : vector<16x128xf32>
    %8 = arith.truncf %7 : vector<16x128xf32> to vector<16x128xbf16>
    %c0_6 = arith.constant 0 : index
    %c0_7 = arith.constant 0 : index
    %9 = vector.load %arg4[%c0_6, %c0_7] : memref<128x128xbf16, #tpu.memory_space<vmem>>, vector<128x128xbf16>
    %cst_8 = arith.constant dense<0.000000e+00> : vector<16x128xf32>
    %10 = tpu.matmul %8, %9, %cst_8 {dimension_numbers = #tpu.dot_dimension_numbers<[1], [0], [0], [1], [0, 0, 1, 1], [], []>} : vector<16x128xbf16>, vector<128x128xbf16>, vector<16x128xf32> -> vector<16x128xf32>
    %c0_9 = arith.constant 0 : index
    %c0_10 = arith.constant 0 : index
    %11 = vector.load %arg5[%c0_9, %c0_10] : memref<1x128xf32, #tpu.memory_space<vmem>>, vector<1x128xf32>
    %12 = vector.broadcast %11 : vector<1x128xf32> to vector<16x128xf32>
    %13 = arith.addf %10, %12 : vector<16x128xf32>
    %cst_11 = arith.constant 0.000000e+00 : f32
    %14 = vector.broadcast %cst_11 : f32 to vector<16x128xf32>
    %15 = arith.maximumf %13, %14 : vector<16x128xf32>
    %16 = arith.truncf %15 : vector<16x128xf32> to vector<16x128xbf16>
    %c0_12 = arith.constant 0 : index
    %c0_13 = arith.constant 0 : index
    %17 = vector.load %arg6[%c0_12, %c0_13] : memref<128x256xbf16, #tpu.memory_space<vmem>>, vector<128x256xbf16>
    %cst_14 = arith.constant dense<0.000000e+00> : vector<16x256xf32>
    %18 = tpu.matmul %16, %17, %cst_14 {dimension_numbers = #tpu.dot_dimension_numbers<[1], [0], [0], [1], [0, 0, 1, 1], [], []>} : vector<16x128xbf16>, vector<128x256xbf16>, vector<16x256xf32> -> vector<16x256xf32>
    %c0_15 = arith.constant 0 : index
    %c0_16 = arith.constant 0 : index
    %19 = vector.load %arg7[%c0_15, %c0_16] : memref<1x256xf32, #tpu.memory_space<vmem>>, vector<1x256xf32>
    %20 = vector.broadcast %19 : vector<1x256xf32> to vector<16x256xf32>
    %21 = arith.addf %18, %20 : vector<16x256xf32>
    %c0_17 = arith.constant 0 : index
    %c0_18 = arith.constant 0 : index
    %22 = vector.load %arg8[%c0_17, %c0_18] : memref<16x256xf32, #tpu.memory_space<vmem>>, vector<16x256xf32>
    tpu.vector_store %arg8[%c0_17, %c0_18], %21 {strides = array<i32>} : memref<16x256xf32, #tpu.memory_space<vmem>>, vector<16x256xf32>,
    return
  }
  func.func @transform_0(%arg0: i32) -> (i32, i32) {
    %c0_i32 = arith.constant 0 : i32
    %c0_i32_0 = arith.constant 0 : i32
    return %arg0, %c0_i32 : i32, i32
  }
  func.func @transform_1(%arg0: i32) -> (i32, i32) {
    %c0_i32 = arith.constant 0 : i32
    %c0_i32_0 = arith.constant 0 : i32
    %c0_i32_1 = arith.constant 0 : i32
    return %c0_i32, %c0_i32_0 : i32, i32
  }
  func.func @transform_2(%arg0: i32) -> (i32, i32) {
    %c0_i32 = arith.constant 0 : i32
    %c0_i32_0 = arith.constant 0 : i32
    %c0_i32_1 = arith.constant 0 : i32
    return %c0_i32, %c0_i32_0 : i32, i32
  }
  func.func @transform_3(%arg0: i32) -> (i32, i32) {
    %c0_i32 = arith.constant 0 : i32
    %c0_i32_0 = arith.constant 0 : i32
    %c0_i32_1 = arith.constant 0 : i32
    return %c0_i32, %c0_i32_0 : i32, i32
  }
  func.func @transform_4(%arg0: i32) -> (i32, i32) {
    %c0_i32 = arith.constant 0 : i32
    %c0_i32_0 = arith.constant 0 : i32
    %c0_i32_1 = arith.constant 0 : i32
    return %c0_i32, %c0_i32_0 : i32, i32
  }
  func.func @transform_5(%arg0: i32) -> (i32, i32) {
    %c0_i32 = arith.constant 0 : i32
    %c0_i32_0 = arith.constant 0 : i32
    %c0_i32_1 = arith.constant 0 : i32
    return %c0_i32, %c0_i32_0 : i32, i32
  }
  func.func @transform_6(%arg0: i32) -> (i32, i32) {
    %c0_i32 = arith.constant 0 : i32
    %c0_i32_0 = arith.constant 0 : i32
    %c0_i32_1 = arith.constant 0 : i32
    return %c0_i32, %c0_i32_0 : i32, i32
  }
  func.func @transform_7(%arg0: i32) -> (i32, i32) {
    %c0_i32 = arith.constant 0 : i32
    %c0_i32_0 = arith.constant 0 : i32
    return %arg0, %c0_i32 : i32, i32
  }
}

</mosaic_0001>

<bundles_post_ra>
// kernel: tpu_custom_call.1
= control target key start
LH: loop header
LB: loop body
LE: loop exit
PB: predicated region body
PF: predicated region fallthrough
CT: control target
= control target key end

     0   :  { %12 = vsyncpa [#allocation3], 0  ;;  %s843_s0 = inlined_call_operand.hbm [shape: f32[16,16], index: 0, kind: input, shape index: {}]   ;;  %s844_s1 = inlined_call_operand.hbm [shape: f32[16,128], index: 1, kind: input, shape index: {}]   ;;  %s845_s2 = inlined_call_operand.vmem [shape: f32[1,128], index: 2, kind: input, shape index: {}]   ;;  %s846_s3 = inlined_call_operand.hbm [shape: bf16[128,128], index: 3, kind: input, shape index: {}]   ;;  %s847_s4 = inlined_call_operand.vmem [shape: f32[1,128], index: 4, kind: input, shape index: {}]   ;;  %s848_s5 = inlined_call_operand.hbm [shape: bf16[128,256], index: 5, kind: input, shape index: {}]   ;;  %s849_s6 = inlined_call_operand.vmem [shape: f32[1,256], index: 6, kind: input, shape index: {}]   ;;  %s850_s7 = inlined_call_operand.hbm [shape: f32[16,256], index: 7, kind: output, shape index: {}]  }
   0x1   :  { %13 = vsyncpa [#allocation6], 0 }
   0x2   :  { %14 = vsyncpa [#allocation9], 0 }
   0x3   :  { %15 = vsyncpa [#allocation4], 0  ;;  %s704_s24 = smov [#allocation5]   ;;  %s705_s26 = smov [#allocation2]  }
   0x4   :  { %s33_s25 = sshll.u32 %s704_s24, 4  ;;  %s21_s27 = sshll.u32 %s705_s26, 4  ;;  %s34_s25 = int_to_ptr.vmem [resolvable:$true] %s33_s25  ;;  %s758_s27 = int_to_ptr.vmem [resolvable:$true] %s21_s27 }
   0x5   :  { %s586_s30 = scalar_lea.hbm %s844_s1, 256 }
   0x6   :  { %p587_p0 = scmp.ne.s32.totalorder %s844_s1, %s586_s30  ;;  %p590_p1 = scmp.lt.u32.totalorder %s586_s30, %s844_s1 }
   0x8   :  { %p592_p2 = pnand %p590_p1, %p587_p0 }
   0xa   :  { %595 = shalt.err (!%p592_p2)
}
   0xb   :  { %s596_s12 = scalar_lea.vmem %s34_s25, 256  ;;  %p601_p4 = scmp.lt.s32.totalorder %s34_s25, %s34_s25 }
   0xc   :  { %p597_p3 = scmp.ne.s32.totalorder %s34_s25, %s596_s12  ;;  %p602_p5 = scmp.lt.s32.totalorder %s596_s12, %s596_s12 }
   0xe   :  { %p603_p6 = por %p602_p5, %p601_p4 }
  0x10   :  { %p604_p7 = pnand %p603_p6, %p597_p3 }
  0x12   :  { %607 = shalt.err (!%p604_p7)
}
  0x13   :  { %s706_s13 = smov 128   ;;  %s707_s14 = smov 8  }
  0x14   :  { %39 = dma.hbm_to_vmem [thread:$0]  %s844_s1, 256, %s34_s25, [#allocation6], %s706_s13, %s706_s13, %s707_s14  }
  0x15   :  { %s608_s19 = scalar_lea.hbm %s843_s0, 256 }
  0x16   :  { %p609_p8 = scmp.ne.s32.totalorder %s843_s0, %s608_s19  ;;  %p612_p9 = scmp.lt.u32.totalorder %s608_s19, %s843_s0 }
  0x18   :  { %p614_p10 = pnand %p612_p9, %p609_p8 }
  0x1a   :  { %617 = shalt.err (!%p614_p10)
}
  0x1b   :  { %s618_s24 = scalar_lea.vmem %s758_s27, 256  ;;  %p623_p12 = scmp.lt.s32.totalorder %s758_s27, %s758_s27 }
  0x1c   :  { %p619_p11 = scmp.ne.s32.totalorder %s758_s27, %s618_s24  ;;  %p624_p13 = scmp.lt.s32.totalorder %s618_s24, %s618_s24 }
  0x1e   :  { %p625_p0 = por %p624_p13, %p623_p12 }
  0x20   :  { %p626_p1 = pnand %p625_p0, %p619_p11 }
  0x22   :  { %629 = shalt.err (!%p626_p1)
}
  0x23   :  { %27 = dma.hbm_to_vmem [thread:$0]  %s843_s0, 256, %s758_s27, [#allocation3], %s706_s13, %s706_s13, %s707_s14  }
  0x24   :  { %s708_s26 = smov [#allocation7]   ;;  %s630_s8 = scalar_lea.hbm %s846_s3, 1024 }
  0x25   :  { %s47_s28 = sshll.u32 %s708_s26, 4  ;;  %p631_p2 = scmp.ne.s32.totalorder %s846_s3, %s630_s8  ;;  %s48_s28 = int_to_ptr.vmem [resolvable:$true] %s47_s28 }
  0x26   :  { %p634_p3 = scmp.lt.u32.totalorder %s630_s8, %s846_s3 }
  0x28   :  { %p636_p4 = pnand %p634_p3, %p631_p2 }
  0x2a   :  { %639 = shalt.err (!%p636_p4)
}
  0x2b   :  { %s640_s15 = scalar_lea.vmem %s48_s28, 1024  ;;  %p645_p6 = scmp.lt.s32.totalorder %s48_s28, %s48_s28 }
  0x2c   :  { %p641_p5 = scmp.ne.s32.totalorder %s48_s28, %s640_s15  ;;  %p646_p7 = scmp.lt.s32.totalorder %s640_s15, %s640_s15 }
  0x2e   :  { %p647_p8 = por %p646_p7, %p645_p6 }
  0x30   :  { %p648_p9 = pnand %p647_p8, %p641_p5 }
  0x32   :  { %651 = shalt.err (!%p648_p9)
}
  0x33   :  { %s709_s0 = smov 64   ;;  %s710_s27 = smov 4  }
  0x34   :  { %53 = dma.hbm_to_vmem [thread:$0]  %s846_s3, 1024, %s48_s28, [#allocation6], %s709_s0, %s709_s0, %s710_s27  }
  0x35   :  { %s711_s18 = smov [#allocation8]   ;;  %s652_s22 = scalar_lea.hbm %s848_s5, 2048 }
  0x36   :  { %s61_s19 = sshll.u32 %s711_s18, 4  ;;  %p653_p10 = scmp.ne.s32.totalorder %s848_s5, %s652_s22  ;;  %s62_s19 = int_to_ptr.vmem [resolvable:$true] %s61_s19 }
  0x37   :  { %p656_p11 = scmp.lt.u32.totalorder %s652_s22, %s848_s5 }
  0x39   :  { %p658_p12 = pnand %p656_p11, %p653_p10 }
  0x3b   :  { %661 = shalt.err (!%p658_p12)
}
  0x3c   :  { %s662_s26 = scalar_lea.vmem %s62_s19, 2048  ;;  %p667_p0 = scmp.lt.s32.totalorder %s62_s19, %s62_s19 }
  0x3d   :  { %p663_p13 = scmp.ne.s32.totalorder %s62_s19, %s662_s26  ;;  %p668_p1 = scmp.lt.s32.totalorder %s662_s26, %s662_s26 }
  0x3f   :  { %p669_p2 = por %p668_p1, %p667_p0 }
  0x41   :  { %p670_p3 = pnand %p669_p2, %p663_p13 }
  0x43   :  { %673 = shalt.err (!%p670_p3)
}
  0x44   :  { %67 = dma.hbm_to_vmem [thread:$0]  %s848_s5, 2048, %s62_s19, [#allocation9], %s706_s13, %s706_s13, %s707_s14  }
  0x45   :  { %696 = dma.done.wait [#allocation3], 256  }
  0x46   :  { %697 = vsyncadd [#allocation3], 4294967040 }
  0x47   :  { %698 = dma.done.wait [#allocation6], 1280  }
  0x48   :  { %699 = vsyncadd [#allocation6], 4294966016 }
  0x49   :  { %700 = dma.done.wait [#allocation9], 2048  }
  0x4a   :  { %701 = vsyncadd [#allocation9], 4294965248  ;;  %v712_v0 = vmov 0.0   ;;  %vm94_vm0 = vcmask 130048   ;;  %v85_v1 = vld [vmem:[#allocation5] sm:$0xff]  ;;  %v86_v2 = vld [vmem:[#allocation5 + $0x8] sm:$0xff]  ;;  %v312_v49 = vlaneseq }
  0x4b   :  { %516 = vmatprep.subr.bf16.mxu1 %v712_v0  ;;  %v83_v3 = vld [vmem:[#allocation2] sm:$0xff]  ;;  %v536_v4 = vpack.c.bf16 %v86_v2, %v85_v1  ;;  %v84_v6 = vld [vmem:[#allocation2 + $0x8] sm:$0xff]  ;;  %v556_v8 = vld [vmem:[#allocation7 + $0x10] sm:$0xff]   ;;  %vm713_vm1 = vmmov 0   ;;  %v714_v38 = vmov 0  }
  0x4c   :  { %513 = vmatprep.mubr.msk.f32.mxu0 %vm94_vm0, %v83_v3  ;;  %v554_v5 = vld [vmem:[#allocation7] sm:$0xff]   ;;  %v555_v7 = vld [vmem:[#allocation7 + $0x8] sm:$0xff]   ;;  %v557_v9 = vld [vmem:[#allocation7 + $0x18] sm:$0xff]   ;;  %532 = vmatprep.mubr.msk.bf16.mxu1 %vm713_vm1, %v712_v0  ;;  %v313_v50 = vshrl.u32 %v312_v49, 7 }
  0x4d   :  { %537 = vmatprep.subr.bf16.mxu0 %v536_v4  ;;  %517 = vmatpush3.bf16.msra.mxu1 %v554_v5  ;;  %v558_v10 = vld [vmem:[#allocation7 + $0x20] sm:$0xff]   ;;  %v559_v11 = vld [vmem:[#allocation7 + $0x28] sm:$0xff]   ;;  %v560_v12 = vld [vmem:[#allocation7 + $0x30] sm:$0xff]  }
  0x4e   :  { %539 = vmatpush3.bf16.msra.mxu0 %v536_v4  ;;  %518 = vmatprep.subr.bf16.mxu1 %v712_v0  ;;  %v561_v13 = vld [vmem:[#allocation7 + $0x38] sm:$0xff]   ;;  %v562_v14 = vld [vmem:[#allocation8] ss:$8 sps:$4 sm:$0xff]   ;;  %v564_v15 = vld [vmem:[#allocation8 + $0x4] ss:$8 sps:$4 sm:$0xff]   ;;  %v314_v51 = vsub.s32 0, %v313_v50 }
  0x4f   :  { %v567_v16 = vld [vmem:[#allocation8 + $0x14] ss:$8 sps:$4 sm:$0xff]   ;;  %402 = vmatprep.subr.bf16.mxu0 %v564_v15  ;;  %v565_v17 = vld [vmem:[#allocation8 + $0x10] ss:$8 sps:$4 sm:$0xff]   ;;  %v570_v18 = vld [vmem:[#allocation8 + $0x24] ss:$8 sps:$4 sm:$0xff]  }
  0x50   :  { %v568_v19 = vld [vmem:[#allocation8 + $0x20] ss:$8 sps:$4 sm:$0xff]   ;;  %v573_v20 = vld [vmem:[#allocation8 + $0x34] ss:$8 sps:$4 sm:$0xff]   ;;  %v571_v21 = vld [vmem:[#allocation8 + $0x30] ss:$8 sps:$4 sm:$0xff]  }
  0x51   :  { %514 = vmatmul.mubr.msk.f32.vlgmr.msra.gmra.mrb[0].mxu0 %vm94_vm0, %v84_v6  ;;  %519 = vmatpush3.bf16.msra.mxu1 %v555_v7  ;;  %v576_v22 = vld [vmem:[#allocation8 + $0x44] ss:$8 sps:$4 sm:$0xff]   ;;  %v574_v23 = vld [vmem:[#allocation8 + $0x40] ss:$8 sps:$4 sm:$0xff]   ;;  %v579_v24 = vld [vmem:[#allocation8 + $0x54] ss:$8 sps:$4 sm:$0xff]  }
  0x52   :  { %520 = vmatprep.subr.bf16.mxu1 %v712_v0  ;;  %403 = vmatpush1.bf16.msra.mxu0 %v562_v14  ;;  %v577_v25 = vld [vmem:[#allocation8 + $0x50] ss:$8 sps:$4 sm:$0xff]   ;;  %v468_v26 = vld [vmem:[%s845_s2] ss:$0 sm:$0xff]  ;;  %v582_v34 = vld [vmem:[#allocation8 + $0x64] ss:$8 sps:$4 sm:$0xff]  }
  0x53   :  { %404 = vmatprep.subr.bf16.mxu0 %v567_v16  ;;  %v580_v35 = vld [vmem:[#allocation8 + $0x60] ss:$8 sps:$4 sm:$0xff]   ;;  %v585_v36 = vld [vmem:[#allocation8 + $0x74] ss:$8 sps:$4 sm:$0xff]   ;;  %v583_v37 = vld [vmem:[#allocation8 + $0x70] ss:$8 sps:$4 sm:$0xff]   ;;  %434 = vmatprep.mubr.bf16.mxu0 %v714_v38 }
  0x54   :  { %v471_v39 = vld [vmem:[%s847_s4] ss:$0 sm:$0xff]  ;;  %v318_v53 = vsub.s32 1, %v313_v50  ;;  %s715_s4 = smov [#allocation10]  }
  0x55   :  { %521 = vmatpush3.bf16.msra.mxu1 %v556_v8  ;;  %v310_v52 = vld [vmem:[%s849_s6] sm:$0x3]  ;;  %s454_s8 = sshll.u32 %s715_s4, 4  ;;  %s455_s8 = int_to_ptr.vmem [resolvable:$true] %s454_s8 }
  0x56   :  { %522 = vmatprep.subr.bf16.mxu1 %v712_v0  ;;  %405 = vmatpush1.bf16.msra.mxu0 %v565_v17  ;;  %v315_v54 = vrot.slane %v310_v52, %v314_v51  ;;  %v319_v55 = vrot.slane %v310_v52, %v318_v53  ;;  %s674_s9 = scalar_lea.vmem %s455_s8, 512  ;;  %p679_p5 = scmp.lt.s32.totalorder %s455_s8, %s455_s8 }
  0x57   :  { %406 = vmatprep.subr.bf16.mxu0 %v570_v18  ;;  %p675_p4 = scmp.ne.s32.totalorder %s455_s8, %s674_s9  ;;  %p680_p6 = scmp.lt.s32.totalorder %s674_s9, %s674_s9 }
  0x59   :  { %523 = vmatpush3.bf16.msra.mxu1 %v557_v9  ;;  %p681_p7 = por %p680_p6, %p679_p5 }
  0x5a   :  { %524 = vmatprep.subr.bf16.mxu1 %v712_v0  ;;  %407 = vmatpush1.bf16.msra.mxu0 %v568_v19 }
  0x5b   :  { %408 = vmatprep.subr.bf16.mxu0 %v573_v20  ;;  %p682_p8 = pnand %p681_p7, %p675_p4 }
  0x5d   :  { %525 = vmatpush3.bf16.msra.mxu1 %v558_v10 }
  0x5e   :  { %526 = vmatprep.subr.bf16.mxu1 %v712_v0  ;;  %409 = vmatpush1.bf16.msra.mxu0 %v571_v21 }
  0x5f   :  { %410 = vmatprep.subr.bf16.mxu0 %v576_v22 }
  0x61   :  { %527 = vmatpush3.bf16.msra.mxu1 %v559_v11 }
  0x62   :  { %528 = vmatprep.subr.bf16.mxu1 %v712_v0  ;;  %411 = vmatpush1.bf16.msra.mxu0 %v574_v23 }
  0x63   :  { %412 = vmatprep.subr.bf16.mxu0 %v579_v24 }
  0x65   :  { %529 = vmatpush3.bf16.msra.mxu1 %v560_v12 }
  0x66   :  { %530 = vmatprep.subr.bf16.mxu1 %v712_v0  ;;  %413 = vmatpush1.bf16.msra.mxu0 %v577_v25 }
  0x67   :  { %414 = vmatprep.subr.bf16.mxu0 %v582_v34 }
  0x69   :  { %531 = vmatpush3.bf16.msra.mxu1 %v561_v13 }
  0x6a   :  { %415 = vmatpush1.bf16.msra.mxu0 %v580_v35 }
  0x6b   :  { %416 = vmatprep.subr.bf16.mxu0 %v585_v36 }
  0x6e   :  { %417 = vmatpush1.bf16.msra.mxu0 %v583_v37 }
 0x124   :  { %v515_v27 = vpop.f32.mrb[0].mxu0 }
 0x125   :  { %v173_v28 = vadd.f32 %v515_v27, %v468_v26  ;;  %v167_v29 = vpop.f32.mrb[1].mxu0 }
 0x126   :  { %v168_v30 = vadd.f32 %v468_v26, %v167_v29 }
 0x127   :  { %v177_v31 = vmax.f32 %v173_v28, 0.0 }
 0x128   :  { %v176_v32 = vmax.f32 %v168_v30, 0.0 }
 0x12a   :  { %v178_v33 = vpack.c.bf16 %v177_v31, %v176_v32 }
 0x12c   :  { %533 = vmatmul.mubr.bf16.vlgmr.msra.gmra.mrb[0].mxu1 %v178_v33 }
 0x1ff   :  { %v284_v40 = vpop.f32.mrb[0].mxu1 }
 0x200   :  { %v285_v41 = vadd.f32 %v471_v39, %v284_v40  ;;  %v534_v42 = vpop.f32.mrb[1].mxu1 }
 0x201   :  { %v287_v43 = vpop.f32.mrb[2].mxu1 }
 0x202   :  { %v288_v44 = vadd.f32 %v471_v39, %v287_v43  ;;  %v535_v45 = vpop.f32.mrb[3].mxu1  ;;  %v291_v46 = vmax.f32 %v285_v41, 0.0 }
 0x204   :  { %v292_v47 = vmax.f32 %v288_v44, 0.0 }
 0x206   :  { %v293_v48 = vpack.c.bf16 %v292_v47, %v291_v46 }
 0x208   :  { %435 = vmatmul.mubr.bf16.vlgmr.msra.gmra.mrb[4].mxu0 %v293_v48 }
 0x2db   :  { %v436_v56 = vpop.f32.mrb[4].mxu0 }
 0x2dc   :  { %v437_v57 = vadd.f32 %v436_v56, %v315_v54  ;;  %v438_v58 = vpop.f32.mrb[5].mxu0 }
 0x2dd   :  { %v439_v59 = vadd.f32 %v438_v58, %v319_v55  ;;  %v440_v60 = vpop.f32.mrb[6].mxu0 }
 0x2de   :  { %445 = vst [vmem:[#allocation10] sm:$0xff] %v437_v57  ;;  %v441_v61 = vadd.f32 %v440_v60, %v315_v54  ;;  %v442_v62 = vpop.f32.mrb[7].mxu0 }
 0x2df   :  { %446 = vst [vmem:[#allocation10 + $0x8] sm:$0xff] %v439_v59  ;;  %v443_v63 = vadd.f32 %v442_v62, %v319_v55 }
 0x2e0   :  { %447 = vst [vmem:[#allocation10 + $0x10] sm:$0xff] %v441_v61 }
 0x2e1   :  { %448 = vst [vmem:[#allocation10 + $0x18] sm:$0xff] %v443_v63 }
 0x2e2   :  { %685 = shalt.err (!%p682_p8)
}
 0x2e3   :  { %s686_s11 = scalar_lea.hbm %s850_s7, 512 }
 0x2e4   :  { %p687_p9 = scmp.ne.s32.totalorder %s850_s7, %s686_s11  ;;  %p690_p10 = scmp.lt.u32.totalorder %s686_s11, %s850_s7 }
 0x2e6   :  { %p692_p11 = pnand %p690_p10, %p687_p9 }
 0x2e8   :  { %695 = shalt.err (!%p692_p11)
}
 0x2e9   :  { %s716_s16 = smov 256   ;;  %s717_s17 = smov 16  }
 0x2ea   :  { %460 = dma.vmem_to_hbm [thread:$0]  %s455_s8, 512, %s850_s7, [#allocation4], %s716_s16, %s716_s16, %s717_s17  }
 0x2eb   :  { %702 = dma.done.wait [#allocation4], 512  }
 0x2ec   :  { %703 = vsyncadd [#allocation4], 4294966784 }
 0x2ed   :  { %464 = vsyncpa [#allocation3], 1 }
 0x2ee   :  { %465 = vsyncpa [#allocation6], 1 }
 0x2ef   :  { %466 = vsyncpa [#allocation9], 1 }
 0x2f0   :  { %467 = vsyncpa [#allocation4], 1 }

// kernel: tpu_custom_call.1
= control target key start
LH: loop header
LB: loop body
LE: loop exit
PB: predicated region body
PF: predicated region fallthrough
CT: control target
= control target key end

     0   :  { %12 = vsyncpa [#allocation3], 0  ;;  %s843_s0 = inlined_call_operand.hbm [shape: f32[16,16], index: 0, kind: input, shape index: {}]   ;;  %s844_s1 = inlined_call_operand.hbm [shape: f32[16,128], index: 1, kind: input, shape index: {}]   ;;  %s845_s2 = inlined_call_operand.vmem [shape: f32[1,128], index: 2, kind: input, shape index: {}]   ;;  %s846_s3 = inlined_call_operand.hbm [shape: bf16[128,128], index: 3, kind: input, shape index: {}]   ;;  %s847_s4 = inlined_call_operand.vmem [shape: f32[1,128], index: 4, kind: input, shape index: {}]   ;;  %s848_s5 = inlined_call_operand.hbm [shape: bf16[128,256], index: 5, kind: input, shape index: {}]   ;;  %s849_s6 = inlined_call_operand.vmem [shape: f32[1,256], index: 6, kind: input, shape index: {}]   ;;  %s850_s7 = inlined_call_operand.hbm [shape: f32[16,256], index: 7, kind: output, shape index: {}]  }
   0x1   :  { %13 = vsyncpa [#allocation6], 0 }
   0x2   :  { %14 = vsyncpa [#allocation9], 0 }
   0x3   :  { %15 = vsyncpa [#allocation4], 0  ;;  %s704_s24 = smov [#allocation5]   ;;  %s705_s26 = smov [#allocation2]  }
   0x4   :  { %s33_s25 = sshll.u32 %s704_s24, 4  ;;  %s21_s27 = sshll.u32 %s705_s26, 4  ;;  %s34_s25 = int_to_ptr.vmem [resolvable:$true] %s33_s25  ;;  %s758_s27 = int_to_ptr.vmem [resolvable:$true] %s21_s27 }
   0x5   :  { %s586_s30 = scalar_lea.hbm %s844_s1, 256 }
   0x6   :  { %p587_p0 = scmp.ne.s32.totalorder %s844_s1, %s586_s30  ;;  %p590_p1 = scmp.lt.u32.totalorder %s586_s30, %s844_s1 }
   0x8   :  { %p592_p2 = pnand %p590_p1, %p587_p0 }
   0xa   :  { %595 = shalt.err (!%p592_p2)
}
   0xb   :  { %s596_s12 = scalar_lea.vmem %s34_s25, 256  ;;  %p601_p4 = scmp.lt.s32.totalorder %s34_s25, %s34_s25 }
   0xc   :  { %p597_p3 = scmp.ne.s32.totalorder %s34_s25, %s596_s12  ;;  %p602_p5 = scmp.lt.s32.totalorder %s596_s12, %s596_s12 }
   0xe   :  { %p603_p6 = por %p602_p5, %p601_p4 }
  0x10   :  { %p604_p7 = pnand %p603_p6, %p597_p3 }
  0x12   :  { %607 = shalt.err (!%p604_p7)
}
  0x13   :  { %s706_s13 = smov 128   ;;  %s707_s14 = smov 8  }
  0x14   :  { %39 = dma.hbm_to_vmem [thread:$0]  %s844_s1, 256, %s34_s25, [#allocation6], %s706_s13, %s706_s13, %s707_s14  }
  0x15   :  { %s608_s19 = scalar_lea.hbm %s843_s0, 256 }
  0x16   :  { %p609_p8 = scmp.ne.s32.totalorder %s843_s0, %s608_s19  ;;  %p612_p9 = scmp.lt.u32.totalorder %s608_s19, %s843_s0 }
  0x18   :  { %p614_p10 = pnand %p612_p9, %p609_p8 }
  0x1a   :  { %617 = shalt.err (!%p614_p10)
}
  0x1b   :  { %s618_s24 = scalar_lea.vmem %s758_s27, 256  ;;  %p623_p12 = scmp.lt.s32.totalorder %s758_s27, %s758_s27 }
  0x1c   :  { %p619_p11 = scmp.ne.s32.totalorder %s758_s27, %s618_s24  ;;  %p624_p13 = scmp.lt.s32.totalorder %s618_s24, %s618_s24 }
  0x1e   :  { %p625_p0 = por %p624_p13, %p623_p12 }
  0x20   :  { %p626_p1 = pnand %p625_p0, %p619_p11 }
  0x22   :  { %629 = shalt.err (!%p626_p1)
}
  0x23   :  { %27 = dma.hbm_to_vmem [thread:$0]  %s843_s0, 256, %s758_s27, [#allocation3], %s706_s13, %s706_s13, %s707_s14  }
  0x24   :  { %s708_s26 = smov [#allocation7]   ;;  %s630_s8 = scalar_lea.hbm %s846_s3, 1024 }
  0x25   :  { %s47_s28 = sshll.u32 %s708_s26, 4  ;;  %p631_p2 = scmp.ne.s32.totalorder %s846_s3, %s630_s8  ;;  %s48_s28 = int_to_ptr.vmem [resolvable:$true] %s47_s28 }
  0x26   :  { %p634_p3 = scmp.lt.u32.totalorder %s630_s8, %s846_s3 }
  0x28   :  { %p636_p4 = pnand %p634_p3, %p631_p2 }
  0x2a   :  { %639 = shalt.err (!%p636_p4)
}
  0x2b   :  { %s640_s15 = scalar_lea.vmem %s48_s28, 1024  ;;  %p645_p6 = scmp.lt.s32.totalorder %s48_s28, %s48_s28 }
  0x2c   :  { %p641_p5 = scmp.ne.s32.totalorder %s48_s28, %s640_s15  ;;  %p646_p7 = scmp.lt.s32.totalorder %s640_s15, %s640_s15 }
  0x2e   :  { %p647_p8 = por %p646_p7, %p645_p6 }
  0x30   :  { %p648_p9 = pnand %p647_p8, %p641_p5 }
  0x32   :  { %651 = shalt.err (!%p648_p9)
}
  0x33   :  { %s709_s0 = smov 64   ;;  %s710_s27 = smov 4  }
  0x34   :  { %53 = dma.hbm_to_vmem [thread:$0]  %s846_s3, 1024, %s48_s28, [#allocation6], %s709_s0, %s709_s0, %s710_s27  }
  0x35   :  { %s711_s18 = smov [#allocation8]   ;;  %s652_s22 = scalar_lea.hbm %s848_s5, 2048 }
  0x36   :  { %s61_s19 = sshll.u32 %s711_s18, 4  ;;  %p653_p10 = scmp.ne.s32.totalorder %s848_s5, %s652_s22  ;;  %s62_s19 = int_to_ptr.vmem [resolvable:$true] %s61_s19 }
  0x37   :  { %p656_p11 = scmp.lt.u32.totalorder %s652_s22, %s848_s5 }
  0x39   :  { %p658_p12 = pnand %p656_p11, %p653_p10 }
  0x3b   :  { %661 = shalt.err (!%p658_p12)
}
  0x3c   :  { %s662_s26 = scalar_lea.vmem %s62_s19, 2048  ;;  %p667_p0 = scmp.lt.s32.totalorder %s62_s19, %s62_s19 }
  0x3d   :  { %p663_p13 = scmp.ne.s32.totalorder %s62_s19, %s662_s26  ;;  %p668_p1 = scmp.lt.s32.totalorder %s662_s26, %s662_s26 }
  0x3f   :  { %p669_p2 = por %p668_p1, %p667_p0 }
  0x41   :  { %p670_p3 = pnand %p669_p2, %p663_p13 }
  0x43   :  { %673 = shalt.err (!%p670_p3)
}
  0x44   :  { %67 = dma.hbm_to_vmem [thread:$0]  %s848_s5, 2048, %s62_s19, [#allocation9], %s706_s13, %s706_s13, %s707_s14  }
  0x45   :  { %696 = dma.done.wait [#allocation3], 256  }
  0x46   :  { %697 = vsyncadd [#allocation3], 4294967040 }
  0x47   :  { %698 = dma.done.wait [#allocation6], 1280  }
  0x48   :  { %699 = vsyncadd [#allocation6], 4294966016 }
  0x49   :  { %700 = dma.done.wait [#allocation9], 2048  }
  0x4a   :  { %701 = vsyncadd [#allocation9], 4294965248  ;;  %v712_v0 = vmov 0.0   ;;  %vm94_vm0 = vcmask 130048   ;;  %v85_v1 = vld [vmem:[#allocation5] sm:$0xff]  ;;  %v86_v2 = vld [vmem:[#allocation5 + $0x8] sm:$0xff]  ;;  %v312_v49 = vlaneseq }
  0x4b   :  { %516 = vmatprep.subr.bf16.mxu1 %v712_v0  ;;  %v83_v3 = vld [vmem:[#allocation2] sm:$0xff]  ;;  %v536_v4 = vpack.c.bf16 %v86_v2, %v85_v1  ;;  %v84_v6 = vld [vmem:[#allocation2 + $0x8] sm:$0xff]  ;;  %v556_v8 = vld [vmem:[#allocation7 + $0x10] sm:$0xff]   ;;  %vm713_vm1 = vmmov 0   ;;  %v714_v38 = vmov 0  }
  0x4c   :  { %513 = vmatprep.mubr.msk.f32.mxu0 %vm94_vm0, %v83_v3  ;;  %v554_v5 = vld [vmem:[#allocation7] sm:$0xff]   ;;  %v555_v7 = vld [vmem:[#allocation7 + $0x8] sm:$0xff]   ;;  %v557_v9 = vld [vmem:[#allocation7 + $0x18] sm:$0xff]   ;;  %532 = vmatprep.mubr.msk.bf16.mxu1 %vm713_vm1, %v712_v0  ;;  %v313_v50 = vshrl.u32 %v312_v49, 7 }
  0x4d   :  { %537 = vmatprep.subr.bf16.mxu0 %v536_v4  ;;  %517 = vmatpush3.bf16.msra.mxu1 %v554_v5  ;;  %v558_v10 = vld [vmem:[#allocation7 + $0x20] sm:$0xff]   ;;  %v559_v11 = vld [vmem:[#allocation7 + $0x28] sm:$0xff]   ;;  %v560_v12 = vld [vmem:[#allocation7 + $0x30] sm:$0xff]  }
  0x4e   :  { %539 = vmatpush3.bf16.msra.mxu0 %v536_v4  ;;  %518 = vmatprep.subr.bf16.mxu1 %v712_v0  ;;  %v561_v13 = vld [vmem:[#allocation7 + $0x38] sm:$0xff]   ;;  %v562_v14 = vld [vmem:[#allocation8] ss:$8 sps:$4 sm:$0xff]   ;;  %v564_v15 = vld [vmem:[#allocation8 + $0x4] ss:$8 sps:$4 sm:$0xff]   ;;  %v314_v51 = vsub.s32 0, %v313_v50 }
  0x4f   :  { %v567_v16 = vld [vmem:[#allocation8 + $0x14] ss:$8 sps:$4 sm:$0xff]   ;;  %402 = vmatprep.subr.bf16.mxu0 %v564_v15  ;;  %v565_v17 = vld [vmem:[#allocation8 + $0x10] ss:$8 sps:$4 sm:$0xff]   ;;  %v570_v18 = vld [vmem:[#allocation8 + $0x24] ss:$8 sps:$4 sm:$0xff]  }
  0x50   :  { %v568_v19 = vld [vmem:[#allocation8 + $0x20] ss:$8 sps:$4 sm:$0xff]   ;;  %v573_v20 = vld [vmem:[#allocation8 + $0x34] ss:$8 sps:$4 sm:$0xff]   ;;  %v571_v21 = vld [vmem:[#allocation8 + $0x30] ss:$8 sps:$4 sm:$0xff]  }
  0x51   :  { %514 = vmatmul.mubr.msk.f32.vlgmr.msra.gmra.mrb[0].mxu0 %vm94_vm0, %v84_v6  ;;  %519 = vmatpush3.bf16.msra.mxu1 %v555_v7  ;;  %v576_v22 = vld [vmem:[#allocation8 + $0x44] ss:$8 sps:$4 sm:$0xff]   ;;  %v574_v23 = vld [vmem:[#allocation8 + $0x40] ss:$8 sps:$4 sm:$0xff]   ;;  %v579_v24 = vld [vmem:[#allocation8 + $0x54] ss:$8 sps:$4 sm:$0xff]  }
  0x52   :  { %520 = vmatprep.subr.bf16.mxu1 %v712_v0  ;;  %403 = vmatpush1.bf16.msra.mxu0 %v562_v14  ;;  %v577_v25 = vld [vmem:[#allocation8 + $0x50] ss:$8 sps:$4 sm:$0xff]   ;;  %v468_v26 = vld [vmem:[%s845_s2] ss:$0 sm:$0xff]  ;;  %v582_v34 = vld [vmem:[#allocation8 + $0x64] ss:$8 sps:$4 sm:$0xff]  }
  0x53   :  { %404 = vmatprep.subr.bf16.mxu0 %v567_v16  ;;  %v580_v35 = vld [vmem:[#allocation8 + $0x60] ss:$8 sps:$4 sm:$0xff]   ;;  %v585_v36 = vld [vmem:[#allocation8 + $0x74] ss:$8 sps:$4 sm:$0xff]   ;;  %v583_v37 = vld [vmem:[#allocation8 + $0x70] ss:$8 sps:$4 sm:$0xff]   ;;  %434 = vmatprep.mubr.bf16.mxu0 %v714_v38 }
  0x54   :  { %v471_v39 = vld [vmem:[%s847_s4] ss:$0 sm:$0xff]  ;;  %v318_v53 = vsub.s32 1, %v313_v50  ;;  %s715_s4 = smov [#allocation10]  }
  0x55   :  { %521 = vmatpush3.bf16.msra.mxu1 %v556_v8  ;;  %v310_v52 = vld [vmem:[%s849_s6] sm:$0x3]  ;;  %s454_s8 = sshll.u32 %s715_s4, 4  ;;  %s455_s8 = int_to_ptr.vmem [resolvable:$true] %s454_s8 }
  0x56   :  { %522 = vmatprep.subr.bf16.mxu1 %v712_v0  ;;  %405 = vmatpush1.bf16.msra.mxu0 %v565_v17  ;;  %v315_v54 = vrot.slane %v310_v52, %v314_v51  ;;  %v319_v55 = vrot.slane %v310_v52, %v318_v53  ;;  %s674_s9 = scalar_lea.vmem %s455_s8, 512  ;;  %p679_p5 = scmp.lt.s32.totalorder %s455_s8, %s455_s8 }
  0x57   :  { %406 = vmatprep.subr.bf16.mxu0 %v570_v18  ;;  %p675_p4 = scmp.ne.s32.totalorder %s455_s8, %s674_s9  ;;  %p680_p6 = scmp.lt.s32.totalorder %s674_s9, %s674_s9 }
  0x59   :  { %523 = vmatpush3.bf16.msra.mxu1 %v557_v9  ;;  %p681_p7 = por %p680_p6, %p679_p5 }
  0x5a   :  { %524 = vmatprep.subr.bf16.mxu1 %v712_v0  ;;  %407 = vmatpush1.bf16.msra.mxu0 %v568_v19 }
  0x5b   :  { %408 = vmatprep.subr.bf16.mxu0 %v573_v20  ;;  %p682_p8 = pnand %p681_p7, %p675_p4 }
  0x5d   :  { %525 = vmatpush3.bf16.msra.mxu1 %v558_v10 }
  0x5e   :  { %526 = vmatprep.subr.bf16.mxu1 %v712_v0  ;;  %409 = vmatpush1.bf16.msra.mxu0 %v571_v21 }
  0x5f   :  { %410 = vmatprep.subr.bf16.mxu0 %v576_v22 }
  0x61   :  { %527 = vmatpush3.bf16.msra.mxu1 %v559_v11 }
  0x62   :  { %528 = vmatprep.subr.bf16.mxu1 %v712_v0  ;;  %411 = vmatpush1.bf16.msra.mxu0 %v574_v23 }
  0x63   :  { %412 = vmatprep.subr.bf16.mxu0 %v579_v24 }
  0x65   :  { %529 = vmatpush3.bf16.msra.mxu1 %v560_v12 }
  0x66   :  { %530 = vmatprep.subr.bf16.mxu1 %v712_v0  ;;  %413 = vmatpush1.bf16.msra.mxu0 %v577_v25 }
  0x67   :  { %414 = vmatprep.subr.bf16.mxu0 %v582_v34 }
  0x69   :  { %531 = vmatpush3.bf16.msra.mxu1 %v561_v13 }
  0x6a   :  { %415 = vmatpush1.bf16.msra.mxu0 %v580_v35 }
  0x6b   :  { %416 = vmatprep.subr.bf16.mxu0 %v585_v36 }
  0x6e   :  { %417 = vmatpush1.bf16.msra.mxu0 %v583_v37 }
 0x124   :  { %v515_v27 = vpop.f32.mrb[0].mxu0 }
 0x125   :  { %v173_v28 = vadd.f32 %v515_v27, %v468_v26  ;;  %v167_v29 = vpop.f32.mrb[1].mxu0 }
 0x126   :  { %v168_v30 = vadd.f32 %v468_v26, %v167_v29 }
 0x127   :  { %v177_v31 = vmax.f32 %v173_v28, 0.0 }
 0x128   :  { %v176_v32 = vmax.f32 %v168_v30, 0.0 }
 0x12a   :  { %v178_v33 = vpack.c.bf16 %v177_v31, %v176_v32 }
 0x12c   :  { %533 = vmatmul.mubr.bf16.vlgmr.msra.gmra.mrb[0].mxu1 %v178_v33 }
 0x1ff   :  { %v284_v40 = vpop.f32.mrb[0].mxu1 }
 0x200   :  { %v285_v41 = vadd.f32 %v471_v39, %v284_v40  ;;  %v534_v42 = vpop.f32.mrb[1].mxu1 }
 0x201   :  { %v287_v43 = vpop.f32.mrb[2].mxu1 }
 0x202   :  { %v288_v44 = vadd.f32 %v471_v39, %v287_v43  ;;  %v535_v45 = vpop.f32.mrb[3].mxu1  ;;  %v291_v46 = vmax.f32 %v285_v41, 0.0 }
 0x204   :  { %v292_v47 = vmax.f32 %v288_v44, 0.0 }
 0x206   :  { %v293_v48 = vpack.c.bf16 %v292_v47, %v291_v46 }
 0x208   :  { %435 = vmatmul.mubr.bf16.vlgmr.msra.gmra.mrb[4].mxu0 %v293_v48 }
 0x2db   :  { %v436_v56 = vpop.f32.mrb[4].mxu0 }
 0x2dc   :  { %v437_v57 = vadd.f32 %v436_v56, %v315_v54  ;;  %v438_v58 = vpop.f32.mrb[5].mxu0 }
 0x2dd   :  { %v439_v59 = vadd.f32 %v438_v58, %v319_v55  ;;  %v440_v60 = vpop.f32.mrb[6].mxu0 }
 0x2de   :  { %445 = vst [vmem:[#allocation10] sm:$0xff] %v437_v57  ;;  %v441_v61 = vadd.f32 %v440_v60, %v315_v54  ;;  %v442_v62 = vpop.f32.mrb[7].mxu0 }
 0x2df   :  { %446 = vst [vmem:[#allocation10 + $0x8] sm:$0xff] %v439_v59  ;;  %v443_v63 = vadd.f32 %v442_v62, %v319_v55 }
 0x2e0   :  { %447 = vst [vmem:[#allocation10 + $0x10] sm:$0xff] %v441_v61 }
 0x2e1   :  { %448 = vst [vmem:[#allocation10 + $0x18] sm:$0xff] %v443_v63 }
 0x2e2   :  { %685 = shalt.err (!%p682_p8)
}
 0x2e3   :  { %s686_s11 = scalar_lea.hbm %s850_s7, 512 }
 0x2e4   :  { %p687_p9 = scmp.ne.s32.totalorder %s850_s7, %s686_s11  ;;  %p690_p10 = scmp.lt.u32.totalorder %s686_s11, %s850_s7 }
 0x2e6   :  { %p692_p11 = pnand %p690_p10, %p687_p9 }
 0x2e8   :  { %695 = shalt.err (!%p692_p11)
}
 0x2e9   :  { %s716_s16 = smov 256   ;;  %s717_s17 = smov 16  }
 0x2ea   :  { %460 = dma.vmem_to_hbm [thread:$0]  %s455_s8, 512, %s850_s7, [#allocation4], %s716_s16, %s716_s16, %s717_s17  }
 0x2eb   :  { %702 = dma.done.wait [#allocation4], 512  }
 0x2ec   :  { %703 = vsyncadd [#allocation4], 4294966784 }
 0x2ed   :  { %464 = vsyncpa [#allocation3], 1 }
 0x2ee   :  { %465 = vsyncpa [#allocation6], 1 }
 0x2ef   :  { %466 = vsyncpa [#allocation9], 1 }
 0x2f0   :  { %467 = vsyncpa [#allocation4], 1 }

</bundles_post_ra>
